<compile_context>
chip_gen: v6e
topology: v6e:2x2x1
jax: 0.10.0
libtpu: 0.0.40
codegen_flags: <defaults>
</compile_context>

<pallas_src>
import functools

import jax
import jax.numpy as jnp
from jax.experimental import pallas as pl
from jax.experimental.pallas import tpu as pltpu

_LANE = 128


# ------------------------- chip-aware configuration -------------------------


@functools.lru_cache(maxsize=None)
def _chip_config():
    """Block-size / VMEM-limit / dtype-support knobs per TPU generation."""
    try:
        kind = jax.devices()[0].device_kind.lower()
    except Exception:  # pragma: no cover - defensive
        kind = ""
    if any(tag in kind for tag in ("v2", "v3", "v4", "v5")):
        # v5e & older: 128 MiB physical VMEM but only a 16 MiB default scoped
        # limit, and no bf16 VPU/EUP.  Keep ~4 MiB blocks (in+out, each
        # double-buffered = 16 MiB) and raise the scoped limit.
        return {"block_bytes": 4 << 20, "vmem_limit": 64 << 20,
                "bf16_vpu": False}
    if "v6" in kind:
        # v6e: 128 MiB physical VMEM, bf16 VPU/EUP.  Bigger blocks are free
        # headroom; raise the 32 MiB default scoped limit.
        return {"block_bytes": 8 << 20, "vmem_limit": 64 << 20,
                "bf16_vpu": True}
    # v7x (and unknown/future chips, conservatively): only 64 MiB physical
    # VMEM, 3.2 TB/s HBM -> larger blocks amortize the ~0.35us/step overhead;
    # 4 double-buffered 8 MiB buffers = 32 MiB, limit leaves headroom.
    return {"block_bytes": 8 << 20, "vmem_limit": 44 << 20, "bf16_vpu": True}


# ----------------------------- kernels --------------------------------------


def _elementwise_kernel(x_ref, o_ref, *, act, compute_f32):
    x = x_ref[...]
    if compute_f32:
        # Forced only where needed (v5e transcendentals, erf-gelu on bf16).
        x = x.astype(jnp.float32)
    if act == "relu":
        y = jnp.maximum(x, jnp.zeros_like(x))
    elif act == "sigmoid":
        y = jax.nn.sigmoid(x)
    elif act == "tanh":
        y = jnp.tanh(x)
    elif act == "leaky_relu":
        # F.leaky_relu default negative_slope = 0.01
        y = jnp.where(x >= 0, x, jnp.asarray(0.01, x.dtype) * x)
    elif act == "elu":
        # F.elu default alpha = 1.0
        y = jnp.where(x > 0, x, jnp.expm1(x))
    elif act == "gelu":
        # F.gelu default is the exact erf formulation (kept for PyTorch parity;
        # a tanh-approx variant would route to the EUP slot on v5e).
        inv_sqrt2 = jnp.asarray(0.7071067811865476, x.dtype)
        y = (jnp.asarray(0.5, x.dtype) * x
             * (jnp.asarray(1.0, x.dtype) + jax.lax.erf(x * inv_sqrt2)))
    else:
        raise ValueError("Activation function not supported")
    o_ref[...] = y.astype(o_ref.dtype)


def _softmax_kernel(x_ref, o_ref):
    # Block is (Nb, C, lane_tile); reduce over the channel (sublane) axis.
    x = x_ref[...].astype(jnp.float32)
    m = jnp.max(x, axis=1, keepdims=True)
    e = jnp.exp(x - m)
    denom = jnp.sum(e, axis=1, keepdims=True)
    o_ref[...] = (e * pl.reciprocal(denom, approx=False)).astype(o_ref.dtype)


# ----------------------------- plain-jnp helpers ----------------------------


def _elementwise_jnp(x, act):
    """Plain jnp elementwise activation (used for tiny non-aligned tails)."""
    if act == "relu":
        return jax.nn.relu(x)
    if act == "sigmoid":
        return jax.nn.sigmoid(x)
    if act == "tanh":
        return jnp.tanh(x)
    if act == "leaky_relu":
        return jnp.where(x >= 0, x, 0.01 * x)
    if act == "elu":
        return jnp.where(x > 0, x, jnp.expm1(x))
    if act == "gelu":
        return jax.nn.gelu(x, approximate=False)
    raise ValueError("Activation function not supported")


# ----------------------------- wrappers -------------------------------------


def _elementwise_activation(x, act):
    cfg = _chip_config()
    orig_shape = x.shape
    dtype = x.dtype
    n = x.size
    itemsize = jnp.dtype(dtype).itemsize

    # f32 compute only where it matters:
    #  * erf-gelu kept in f32 for bit-parity with PyTorch,
    #  * other transcendentals forced to f32 only on chips without bf16 VPU/EUP.
    if dtype == jnp.float32:
        compute_f32 = False
    elif act == "gelu":
        compute_f32 = True
    elif act in ("sigmoid", "tanh", "elu"):
        compute_f32 = not cfg["bf16_vpu"]
    else:
        compute_f32 = False

    block_bytes = cfg["block_bytes"]
    if compute_f32:
        block_bytes //= 2  # f32 temps roughly double per-block VMEM footprint

    kernel = functools.partial(_elementwise_kernel, act=act,
                               compute_f32=compute_f32)
    params = pltpu.CompilerParams(
        dimension_semantics=("parallel",),
        vmem_limit_bytes=cfg["vmem_limit"])

    # Lane width: largest multiple of 128 that divides n (lane-dense, no
    # padding copy for typical sizes).
    lane_w = next((c for c in (1024, 512, 256, _LANE) if n % c == 0), None)

    if lane_w is None:
        # n not a multiple of 128.
        if n * itemsize <= block_bytes:
            # Small: one full (1, n) block (block dims == full dims -> legal).
            out = pl.pallas_call(
                kernel,
                out_shape=jax.ShapeDtypeStruct((1, n), dtype),
                grid_spec=pl.GridSpec(
                    grid=(1,),
                    in_specs=[pl.BlockSpec((1, n), lambda i: (0, 0))],
                    out_specs=pl.BlockSpec((1, n), lambda i: (0, 0)),
                ),
                compiler_params=params,
            )(x.reshape(1, n))
            return out.reshape(orig_shape)
        # Rare large & non-aligned case: run the 128-divisible prefix through
        # the tiled kernel and the <128-element tail with plain jnp.
        # TODO(synk): replace the output concat with a masked pltpu.store of
        # the tail inside the last block to make this fully copy-free.
        flat = x.reshape(-1)
        split = (n // _LANE) * _LANE
        head = _elementwise_activation(flat[:split], act)
        tail = _elementwise_jnp(flat[split:], act).astype(dtype)
        return jnp.concatenate([head, tail]).reshape(orig_shape)

    mat = x.reshape(-1, lane_w)
    rows = mat.shape[0]

    # dtype-aware sublane multiple: f32 -> 8, bf16 -> 16, int8/fp8 -> 32.
    sublane = max(8, 8 * (4 // itemsize))
    tile_rows = (block_bytes // (lane_w * itemsize)) // sublane * sublane
    tile_rows = max(sublane, tile_rows)
    if tile_rows >= rows:
        tile_rows = rows  # single block equal to the full dim (always legal)

    grid = (pl.cdiv(rows, tile_rows),)

    out = pl.pallas_call(
        kernel,
        out_shape=jax.ShapeDtypeStruct(mat.shape, dtype),
        grid_spec=pl.GridSpec(
            grid=grid,
            in_specs=[pl.BlockSpec((tile_rows, lane_w), lambda i: (i, 0))],
            out_specs=pl.BlockSpec((tile_rows, lane_w), lambda i: (i, 0)),
        ),
        compiler_params=params,
    )(mat)
    return out.reshape(orig_shape)


def _softmax_activation(x):
    """F.softmax(x) with PyTorch's implicit dim (dim=1 for 4-D NCHW input)."""
    if x.ndim != 4:
        # TODO(synk): PyTorch's implicit-dim rule differs for 2-D/3-D inputs.
        raise NotImplementedError("softmax path implemented for 4-D NCHW input")
    cfg = _chip_config()
    N, C, H, W = x.shape
    HW = H * W
    itemsize = jnp.dtype(x.dtype).itemsize
    x3 = x.reshape(N, C, HW)  # reduce over C (axis 1); spatial axis is lanes

    # Per-element VMEM footprint: in + out (each double-buffered) plus the two
    # f32 intermediates the kernel materializes.
    bytes_per_elem = 2 * (2 * itemsize) + 2 * 4
    max_elems = max(C * _LANE, cfg["block_bytes"] // bytes_per_elem)

    # Lane tile: full spatial extent when it fits (also covers HW % 128 != 0),
    # else a 128-multiple with a masked partial trailing block.
    if C * HW <= max_elems or HW <= _LANE:
        lane_tile = HW
    else:
        lane_tile = min((max_elems // C) // _LANE * _LANE,
                        pl.cdiv(HW, _LANE) * _LANE)
        lane_tile = max(_LANE, lane_tile)

    # Fold several batch elements per block so tiny (C, HW) cases don't pay the
    # per-grid-step overhead once per sample.  NOTE: for C below the sublane
    # pack (e.g. C=4 for f32) each vreg tile is under-packed; accepted.
    nb = max(1, min(N, max_elems // (C * lane_tile)))

    grid = (pl.cdiv(N, nb), pl.cdiv(HW, lane_tile))

    out = pl.pallas_call(
        _softmax_kernel,
        out_shape=jax.ShapeDtypeStruct(x3.shape, x.dtype),
        grid_spec=pl.GridSpec(
            grid=grid,
            in_specs=[pl.BlockSpec((nb, C, lane_tile),
                                   lambda n, s: (n, 0, s))],
            out_specs=pl.BlockSpec((nb, C, lane_tile),
                                   lambda n, s: (n, 0, s)),
        ),
        compiler_params=pltpu.CompilerParams(
            dimension_semantics=("parallel", "parallel"),
            vmem_limit_bytes=cfg["vmem_limit"]),
    )(x3)

    return out.reshape(N, C, H, W)


def activation(x, act):
    """Pallas-backed equivalent of Activation(act).forward(x)."""
    if act in ("relu", "sigmoid", "tanh", "leaky_relu", "elu", "gelu"):
        return _elementwise_activation(x, act)
    elif act == "softmax":
        return _softmax_activation(x)
    else:
        raise ValueError("Activation function not supported")


# ----------------------------- references -----------------------------------


def _reference(x, act):
    if act == "softmax":
        return jax.nn.softmax(x, axis=1)  # PyTorch implicit dim for 4-D input
    return _elementwise_jnp(x, act)


if __name__ == "__main__":
    key = jax.random.PRNGKey(0)
    x = jax.random.normal(key, (2, 4, 16, 16), dtype=jnp.float32)  # NCHW

    acts = ["relu", "sigmoid", "tanh", "softmax", "leaky_relu", "elu", "gelu"]
    for act in acts:
        out = jax.block_until_ready(activation(x, act))
        ref = _reference(x, act)
        assert out.shape == ref.shape and out.dtype == ref.dtype, act
        assert jnp.allclose(out, ref, atol=1e-5, rtol=1e-5), act

    # Exercise the non-128-divisible fallback (single full-block path).
    x_odd = jax.random.normal(jax.random.PRNGKey(1), (3, 5, 7),
                              dtype=jnp.float32)
    for act in ("relu", "gelu"):
        out = jax.block_until_ready(activation(x_odd, act))
        assert jnp.allclose(out, _reference(x_odd, act),
                            atol=1e-5, rtol=1e-5), act

    print("KERNEL_OK")
</pallas_src>

<mosaic_0001>
module attributes {stable_mosaic.version = 11 : i64} {
  func.func @_elementwise_kernel(%arg0: i32, %arg1: memref<2x1024xf32, #tpu.memory_space<vmem>>, %arg2: memref<2x1024xf32, #tpu.memory_space<vmem>>) attributes {dimension_semantics = [#tpu.dimension_semantics<parallel>], iteration_bounds = array<i64: 1>, scalar_prefetch = 0 : i64, scratch_operands = 0 : i64, tpu.core_type = #tpu.core_type<tc>, window_params = [{transform_indices = @transform_0, window_bounds = array<i64: 2, 1024>}, {transform_indices = @transform_1, window_bounds = array<i64: 2, 1024>}]} {
    %c0 = arith.constant 0 : index
    %c0_0 = arith.constant 0 : index
    %0 = vector.load %arg1[%c0, %c0_0] : memref<2x1024xf32, #tpu.memory_space<vmem>>, vector<2x1024xf32>
    %cst = arith.constant 0.000000e+00 : f32
    %1 = vector.broadcast %cst : f32 to vector<2x1024xf32>
    %2 = arith.maximumf %0, %1 : vector<2x1024xf32>
    %c0_1 = arith.constant 0 : index
    %c0_2 = arith.constant 0 : index
    %3 = vector.load %arg2[%c0_1, %c0_2] : memref<2x1024xf32, #tpu.memory_space<vmem>>, vector<2x1024xf32>
    tpu.vector_store %arg2[%c0_1, %c0_2], %2 {strides = array<i32>} : memref<2x1024xf32, #tpu.memory_space<vmem>>, vector<2x1024xf32>,
    return
  }
  func.func @transform_0(%arg0: i32) -> (i32, i32) {
    %c0_i32 = arith.constant 0 : i32
    %c0_i32_0 = arith.constant 0 : i32
    return %arg0, %c0_i32 : i32, i32
  }
  func.func @transform_1(%arg0: i32) -> (i32, i32) {
    %c0_i32 = arith.constant 0 : i32
    %c0_i32_0 = arith.constant 0 : i32
    return %arg0, %c0_i32 : i32, i32
  }
}

</mosaic_0001>

<bundles_post_ra>
// kernel: tpu_custom_call.1
= control target key start
LH: loop header
LB: loop body
LE: loop exit
PB: predicated region body
PF: predicated region fallthrough
CT: control target
= control target key end

     0   :  { %6 = vsyncpa [#allocation3], 0  ;;  %s106_s0 = inlined_call_operand.hbm [shape: f32[2,1024], index: 0, kind: input, shape index: {}]   ;;  %s107_s1 = inlined_call_operand.hbm [shape: f32[2,1024], index: 1, kind: output, shape index: {}]  }
   0x1   :  { %7 = vsyncpa [#allocation4], 0  ;;  %s88_s6 = smov [#allocation2]  }
   0x2   :  { %s14_s7 = sshll.u32 %s88_s6, 4  ;;  %s15_s7 = int_to_ptr.vmem [resolvable:$true] %s14_s7 }
   0x3   :  { %s52_s8 = scalar_lea.vmem %s15_s7, 256  ;;  %p57_p1 = scmp.lt.s32.totalorder %s15_s7, %s15_s7 }
   0x4   :  { %p53_p0 = scmp.ne.s32.totalorder %s15_s7, %s52_s8  ;;  %p58_p2 = scmp.lt.s32.totalorder %s52_s8, %s52_s8 }
   0x6   :  { %p59_p3 = por %p58_p2, %p57_p1 }
   0x8   :  { %p60_p4 = pnand %p59_p3, %p53_p0 }
   0xa   :  { %63 = shalt.err (!%p60_p4)
}
   0xb   :  { %17 = dma.hbm_to_vmem [thread:$0]  %s106_s0, 256, %s15_s7, [#allocation3]  }
   0xc   :  { %84 = dma.done.wait [#allocation3], 256  }
   0xd   :  { %85 = vsyncadd [#allocation3], 4294967040  ;;  %s89_s11 = smov [#allocation5]   ;;  %v21_v0 = vld [vmem:[#allocation2] sm:$0xff]  ;;  %v22_v1 = vld [vmem:[#allocation2 + $0x8] sm:$0xff] }
   0xe   :  { %s33_s12 = sshll.u32 %s89_s11, 4  ;;  %v23_v2 = vmax.f32 %v21_v0, 0.0  ;;  %v24_v3 = vmax.f32 %v22_v1, 0.0  ;;  %s34_s12 = int_to_ptr.vmem [resolvable:$true] %s33_s12 }
   0xf   :  { %s64_s13 = scalar_lea.vmem %s34_s12, 256  ;;  %p69_p6 = scmp.lt.s32.totalorder %s34_s12, %s34_s12 }
  0x10   :  { %25 = vst [vmem:[#allocation5] sm:$0xff] %v23_v2  ;;  %26 = vst [vmem:[#allocation5 + $0x8] sm:$0xff] %v24_v3  ;;  %p65_p5 = scmp.ne.s32.totalorder %s34_s12, %s64_s13  ;;  %p70_p7 = scmp.lt.s32.totalorder %s64_s13, %s64_s13 }
  0x12   :  { %p71_p8 = por %p70_p7, %p69_p6 }
  0x14   :  { %p72_p9 = pnand %p71_p8, %p65_p5 }
  0x16   :  { %75 = shalt.err (!%p72_p9)
}
  0x17   :  { %36 = dma.vmem_to_hbm [thread:$0]  %s34_s12, 256, %s107_s1, [#allocation4]  }
  0x18   :  { %86 = dma.done.wait [#allocation4], 256  }
  0x19   :  { %87 = vsyncadd [#allocation4], 4294967040 }
  0x1a   :  { %40 = vsyncpa [#allocation3], 1 }
  0x1b   :  { %41 = vsyncpa [#allocation4], 1 }

</bundles_post_ra>
